<compile_context>
chip_gen: v7x
topology: tpu7x:2x2x1
jax: 0.10.0
libtpu: 0.0.40
codegen_flags: <defaults>
</compile_context>

<pallas_src>
import functools

import jax
import jax.numpy as jnp
from jax.experimental import pallas as pl
from jax.experimental.pallas import tpu as pltpu


def _head_kernel(x_ref, w1_ref, b1_ref, w2_ref, b2_ref, o_ref, *,
                 collapse_batch, compute_dtype):
    # x_ref : (B, tq, D)   w1_ref: (D, H)   b1_ref: (1, H)
    # w2_ref: (H, O)       b2_ref: (1, O)   o_ref : (B, tq, O)
    w1 = w1_ref[...]
    b1 = b1_ref[...]
    w2 = w2_ref[...]
    b2 = b2_ref[...]

    def mlp(x2d):
        # In-register MXU-input cast (no standalone XLA convert / HBM pass).
        if compute_dtype is not None:
            x2d = x2d.astype(compute_dtype)
        h = jnp.dot(x2d, w1, preferred_element_type=jnp.float32) + b1
        h = jnp.maximum(h, 0.0)                                   # ReLU on VPU
        y = jnp.dot(h.astype(w2.dtype), w2,
                    preferred_element_type=jnp.float32) + b2
        return y

    if collapse_batch:
        # tq % 8 == 0 -> leading-dim collapse is layout-free; one tall matmul.
        B, tq, D = x_ref.shape
        y = mlp(x_ref[...].reshape(B * tq, D))
        o_ref[...] = y.reshape(B, tq, -1).astype(o_ref.dtype)
    else:
        # tq not sublane-aligned (tq == Qc, Qc % 8 != 0): static per-batch
        # unroll of plain 2-D matmuls (small shapes only hit this path).
        for b in range(x_ref.shape[0]):
            o_ref[b] = mlp(x_ref[b]).astype(o_ref.dtype)


def _pick_query_tile(qc, max_tile=1024, min_tile=256):
    """Tile along the per-head query chunk.

    Prefers the largest sublane-aligned divisor of Qc up to max_tile; never
    degrades below min_tile (no tiny-tile perf cliff) -- falls back to the
    whole chunk instead (block == full dim is always legal)."""
    if qc <= max_tile or qc % 8 != 0:
        return qc
    tq = max_tile - (max_tile % 8)
    while tq >= min_tile:
        if qc % tq == 0:
            return tq
        tq -= 8
    return qc


def prepare_param_head_weights(w1, b1, w2, b2, compute_dtype=None):
    """One-time weight prep, hoisted out of the per-call forward.

    Optionally casts the matmul weights to the MXU input dtype (e.g. bf16);
    biases stay f32 since accumulation / bias add are f32."""
    if compute_dtype is not None:
        w1 = w1.astype(compute_dtype)
        w2 = w2.astype(compute_dtype)
    return w1, b1.astype(jnp.float32), w2, b2.astype(jnp.float32)


def param_head_forward(queries, w1, b1, w2, b2, *, compute_dtype=None,
                       out_dtype=None, max_query_tile=1024):
    """queries: (B, Q, D).  Stacked per-predictor weights:
       w1: (P, D, H)  b1: (P, 1, H)  w2: (P, H, O)  b2: (P, 1, O)
    Returns a list of P arrays, each (B, Qc, O) with Qc = Q // P, matching the
    PyTorch list of per-predictor params."""
    B, Q, D = queries.shape
    P, _, H = w1.shape
    O = w2.shape[-1]
    assert Q % P == 0, (
        f"Q={Q} must be divisible by the number of predictors P={P} "
        "(matches torch.split semantics without dropping trailing queries)")
    Qc = Q // P

    # Free, view-only reshape (no transpose / HBM round-trip): the Q axis is
    # split contiguously, exactly like torch .split(Qc, dim=1).
    x = queries.reshape(B, P, Qc, D)

    if out_dtype is None:
        out_dtype = queries.dtype

    tq = _pick_query_tile(Qc, max_query_tile)
    n_qt = Qc // tq                       # _pick_query_tile returns a divisor
    collapse_batch = (tq % 8 == 0)

    kernel = functools.partial(_head_kernel,
                               collapse_batch=collapse_batch,
                               compute_dtype=compute_dtype)

    # Pin megacore sharding (v7x) to the head axis so each core's weights stay
    # VMEM-resident across its inner q-tile iterations.
    dim_sem = ("parallel", "arbitrary") if P > 1 else ("arbitrary", "parallel")

    out = pl.pallas_call(
        kernel,
        out_shape=jax.ShapeDtypeStruct((P, B, Qc, O), out_dtype),
        grid=(P, n_qt),
        in_specs=[
            # activations: one (B, tq, D) slab per (head, q-tile); batch folded
            # into the block so fewer, fatter grid steps / DMAs.
            pl.BlockSpec((B, pl.Squeezed(), tq, D), lambda p, t: (0, p, t, 0)),
            # per-head weights/biases: index_map ignores the q-tile axis -> no
            # re-DMA across the inner loop, weights stay resident per head.
            pl.BlockSpec((pl.Squeezed(), D, H), lambda p, t: (p, 0, 0)),
            pl.BlockSpec((pl.Squeezed(), 1, H), lambda p, t: (p, 0, 0)),
            pl.BlockSpec((pl.Squeezed(), H, O), lambda p, t: (p, 0, 0)),
            pl.BlockSpec((pl.Squeezed(), 1, O), lambda p, t: (p, 0, 0)),
        ],
        # Unpadded output: last dim == full O, contiguous writeback, ~4x less
        # HBM traffic than the previous 128-lane padded store.
        out_specs=pl.BlockSpec((pl.Squeezed(), B, tq, O),
                               lambda p, t: (p, 0, t, 0)),
        compiler_params=pltpu.CompilerParams(dimension_semantics=dim_sem),
    )(x, w1, b1, w2, b2)

    # Per-predictor list: each entry is a contiguous leading-axis slab of the
    # stacked (P, B, Qc, O) output (single cheap pass, no padded re-reads).
    return [out[p] for p in range(P)]


def _ref_forward(queries, w1, b1, w2, b2):
    """Plain-JAX reference of the same semantics."""
    B, Q, D = queries.shape
    P = w1.shape[0]
    Qc = Q // P
    outs = []
    for p in range(P):
        q = queries[:, p * Qc:(p + 1) * Qc, :]                 # (B, Qc, D)
        h = jnp.maximum(jnp.einsum("bqd,dh->bqh", q, w1[p]) + b1[p, 0], 0.0)
        y = jnp.einsum("bqh,ho->bqo", h, w2[p]) + b2[p, 0]
        outs.append(y)
    return outs


def _make_inputs(key, B, Q, D, H, O, P):
    kq, k1, k2, k3, k4 = jax.random.split(key, 5)
    queries = jax.random.normal(kq, (B, Q, D), dtype=jnp.float32)
    w1 = jax.random.normal(k1, (P, D, H), dtype=jnp.float32) * 0.05
    b1 = jax.random.normal(k2, (P, 1, H), dtype=jnp.float32) * 0.01
    w2 = jax.random.normal(k3, (P, H, O), dtype=jnp.float32) * 0.05
    b2 = jax.random.normal(k4, (P, 1, O), dtype=jnp.float32) * 0.01
    return queries, w1, b1, w2, b2


if __name__ == "__main__":
    # 2 predictor heads, hidden=32, output param dim = 11 (3 pos + 2 angle
    # sincos + 6 shape params, matching param2pc slicing).
    D, H, O, P = 32, 32, 11, 2
    key = jax.random.PRNGKey(0)
    k_small, k_big = jax.random.split(key, 2)

    # --- Case 1: tiny query chunk (Qc=4, not sublane-aligned) -> per-batch
    # fallback path.  f32, tight check. -------------------------------------
    queries, w1, b1, w2, b2 = _make_inputs(k_small, B=2, Q=8, D=D, H=H, O=O, P=P)
    ref = _ref_forward(queries, w1, b1, w2, b2)
    params = param_head_forward(queries, w1, b1, w2, b2)
    params = [jax.block_until_ready(p) for p in params]
    for got, want in zip(params, ref):
        assert got.shape == want.shape, (got.shape, want.shape)
        assert jnp.allclose(got, want, atol=1e-5, rtol=1e-5), "f32 small mismatch"

    # --- Case 2: Qc=128 -> batch-folded collapsed-matmul path.  f32. --------
    queries, w1, b1, w2, b2 = _make_inputs(k_big, B=2, Q=256, D=D, H=H, O=O, P=P)
    ref = _ref_forward(queries, w1, b1, w2, b2)
    params = param_head_forward(queries, w1, b1, w2, b2)
    params = [jax.block_until_ready(p) for p in params]
    for got, want in zip(params, ref):
        assert got.shape == want.shape, (got.shape, want.shape)
        assert jnp.allclose(got, want, atol=1e-5, rtol=1e-5), "f32 big mismatch"

    # --- Case 3: bf16 MXU-input path (weights prepared once, activation cast
    # done in-kernel in vregs), f32 accumulation; loose tolerance. -----------
    w1b, b1b, w2b, b2b = prepare_param_head_weights(
        w1, b1, w2, b2, compute_dtype=jnp.bfloat16)
    params_bf16 = param_head_forward(queries, w1b, b1b, w2b, b2b,
                                     compute_dtype=jnp.bfloat16)
    params_bf16 = [jax.block_until_ready(p) for p in params_bf16]
    for got, want in zip(params_bf16, ref):
        assert got.shape == want.shape, (got.shape, want.shape)
        assert jnp.allclose(got, want, atol=5e-2, rtol=5e-2), "bf16 mismatch"

    print("KERNEL_OK")
</pallas_src>

<mosaic_0001>
module attributes {stable_mosaic.version = 11 : i64} {
  func.func @_head_kernel(%arg0: i32, %arg1: i32, %arg2: memref<2x1x4x32xf32, #tpu.memory_space<vmem>>, %arg3: memref<1x32x32xf32, #tpu.memory_space<vmem>>, %arg4: memref<1x1x32xf32, #tpu.memory_space<vmem>>, %arg5: memref<1x32x11xf32, #tpu.memory_space<vmem>>, %arg6: memref<1x1x11xf32, #tpu.memory_space<vmem>>, %arg7: memref<1x2x4x11xf32, #tpu.memory_space<vmem>>) attributes {dimension_semantics = [#tpu.dimension_semantics<parallel>, #tpu.dimension_semantics<arbitrary>], iteration_bounds = array<i64: 2, 1>, scalar_prefetch = 0 : i64, scratch_operands = 0 : i64, tpu.core_type = #tpu.core_type<tc>, window_params = [{transform_indices = @transform_0, window_bounds = array<i64: 2, 1, 4, 32>}, {transform_indices = @transform_1, window_bounds = array<i64: 1, 32, 32>}, {transform_indices = @transform_2, window_bounds = array<i64: 1, 1, 32>}, {transform_indices = @transform_3, window_bounds = array<i64: 1, 32, 11>}, {transform_indices = @transform_4, window_bounds = array<i64: 1, 1, 11>}, {transform_indices = @transform_5, window_bounds = array<i64: 1, 2, 4, 11>}]} {
    %c0 = arith.constant 0 : index
    %c0_0 = arith.constant 0 : index
    %c0_1 = arith.constant 0 : index
    %0 = vector.load %arg3[%c0, %c0_0, %c0_1] : memref<1x32x32xf32, #tpu.memory_space<vmem>>, vector<1x32x32xf32>
    %1 = vector.shape_cast %0 : vector<1x32x32xf32> to vector<32x32xf32>
    %c0_2 = arith.constant 0 : index
    %c0_3 = arith.constant 0 : index
    %c0_4 = arith.constant 0 : index
    %2 = vector.load %arg4[%c0_2, %c0_3, %c0_4] : memref<1x1x32xf32, #tpu.memory_space<vmem>>, vector<1x1x32xf32>
    %3 = vector.shape_cast %2 : vector<1x1x32xf32> to vector<1x32xf32>
    %c0_5 = arith.constant 0 : index
    %c0_6 = arith.constant 0 : index
    %c0_7 = arith.constant 0 : index
    %4 = vector.load %arg5[%c0_5, %c0_6, %c0_7] : memref<1x32x11xf32, #tpu.memory_space<vmem>>, vector<1x32x11xf32>
    %5 = vector.shape_cast %4 : vector<1x32x11xf32> to vector<32x11xf32>
    %c0_8 = arith.constant 0 : index
    %c0_9 = arith.constant 0 : index
    %c0_10 = arith.constant 0 : index
    %6 = vector.load %arg6[%c0_8, %c0_9, %c0_10] : memref<1x1x11xf32, #tpu.memory_space<vmem>>, vector<1x1x11xf32>
    %7 = vector.shape_cast %6 : vector<1x1x11xf32> to vector<1x11xf32>
    %c0_11 = arith.constant 0 : index
    %c0_12 = arith.constant 0 : index
    %c0_13 = arith.constant 0 : index
    %c0_14 = arith.constant 0 : index
    %8 = vector.load %arg2[%c0_11, %c0_12, %c0_13, %c0_14] : memref<2x1x4x32xf32, #tpu.memory_space<vmem>>, vector<1x1x4x32xf32>
    %9 = vector.shape_cast %8 : vector<1x1x4x32xf32> to vector<4x32xf32>
    %cst = arith.constant dense<0.000000e+00> : vector<4x32xf32>
    %10 = tpu.matmul %9, %1, %cst {dimension_numbers = #tpu.dot_dimension_numbers<[1], [0], [0], [1], [0, 0, 1, 1], [], []>} : vector<4x32xf32>, vector<32x32xf32>, vector<4x32xf32> -> vector<4x32xf32>
    %11 = vector.broadcast %3 : vector<1x32xf32> to vector<4x32xf32>
    %12 = arith.addf %10, %11 : vector<4x32xf32>
    %cst_15 = arith.constant 0.000000e+00 : f32
    %13 = vector.broadcast %cst_15 : f32 to vector<4x32xf32>
    %14 = arith.maximumf %12, %13 : vector<4x32xf32>
    %cst_16 = arith.constant dense<0.000000e+00> : vector<4x11xf32>
    %15 = tpu.matmul %14, %5, %cst_16 {dimension_numbers = #tpu.dot_dimension_numbers<[1], [0], [0], [1], [0, 0, 1, 1], [], []>} : vector<4x32xf32>, vector<32x11xf32>, vector<4x11xf32> -> vector<4x11xf32>
    %16 = vector.broadcast %7 : vector<1x11xf32> to vector<4x11xf32>
    %17 = arith.addf %15, %16 : vector<4x11xf32>
    %c0_17 = arith.constant 0 : index
    %c0_18 = arith.constant 0 : index
    %c0_19 = arith.constant 0 : index
    %c0_20 = arith.constant 0 : index
    %18 = vector.load %arg7[%c0_17, %c0_18, %c0_19, %c0_20] : memref<1x2x4x11xf32, #tpu.memory_space<vmem>>, vector<1x1x4x11xf32>
    %19 = vector.shape_cast %18 : vector<1x1x4x11xf32> to vector<4x11xf32>
    %20 = vector.shape_cast %17 : vector<4x11xf32> to vector<1x1x4x11xf32>
    tpu.vector_store %arg7[%c0_17, %c0_18, %c0_19, %c0_20], %20 {strides = array<i32>} : memref<1x2x4x11xf32, #tpu.memory_space<vmem>>, vector<1x1x4x11xf32>,
    %c1 = arith.constant 1 : index
    %c0_21 = arith.constant 0 : index
    %c0_22 = arith.constant 0 : index
    %c0_23 = arith.constant 0 : index
    %21 = vector.load %arg2[%c1, %c0_21, %c0_22, %c0_23] : memref<2x1x4x32xf32, #tpu.memory_space<vmem>>, vector<1x1x4x32xf32>
    %22 = vector.shape_cast %21 : vector<1x1x4x32xf32> to vector<4x32xf32>
    %cst_24 = arith.constant dense<0.000000e+00> : vector<4x32xf32>
    %23 = tpu.matmul %22, %1, %cst_24 {dimension_numbers = #tpu.dot_dimension_numbers<[1], [0], [0], [1], [0, 0, 1, 1], [], []>} : vector<4x32xf32>, vector<32x32xf32>, vector<4x32xf32> -> vector<4x32xf32>
    %24 = vector.broadcast %3 : vector<1x32xf32> to vector<4x32xf32>
    %25 = arith.addf %23, %24 : vector<4x32xf32>
    %cst_25 = arith.constant 0.000000e+00 : f32
    %26 = vector.broadcast %cst_25 : f32 to vector<4x32xf32>
    %27 = arith.maximumf %25, %26 : vector<4x32xf32>
    %cst_26 = arith.constant dense<0.000000e+00> : vector<4x11xf32>
    %28 = tpu.matmul %27, %5, %cst_26 {dimension_numbers = #tpu.dot_dimension_numbers<[1], [0], [0], [1], [0, 0, 1, 1], [], []>} : vector<4x32xf32>, vector<32x11xf32>, vector<4x11xf32> -> vector<4x11xf32>
    %29 = vector.broadcast %7 : vector<1x11xf32> to vector<4x11xf32>
    %30 = arith.addf %28, %29 : vector<4x11xf32>
    %c0_27 = arith.constant 0 : index
    %c1_28 = arith.constant 1 : index
    %c0_29 = arith.constant 0 : index
    %c0_30 = arith.constant 0 : index
    %31 = vector.load %arg7[%c0_27, %c1_28, %c0_29, %c0_30] : memref<1x2x4x11xf32, #tpu.memory_space<vmem>>, vector<1x1x4x11xf32>
    %32 = vector.shape_cast %31 : vector<1x1x4x11xf32> to vector<4x11xf32>
    %33 = vector.shape_cast %30 : vector<4x11xf32> to vector<1x1x4x11xf32>
    tpu.vector_store %arg7[%c0_27, %c1_28, %c0_29, %c0_30], %33 {strides = array<i32>} : memref<1x2x4x11xf32, #tpu.memory_space<vmem>>, vector<1x1x4x11xf32>,
    return
  }
  func.func @transform_0(%arg0: i32, %arg1: i32) -> (i32, i32, i32, i32) {
    %c0_i32 = arith.constant 0 : i32
    %c0_i32_0 = arith.constant 0 : i32
    %c0_i32_1 = arith.constant 0 : i32
    return %c0_i32, %arg0, %arg1, %c0_i32_0 : i32, i32, i32, i32
  }
  func.func @transform_1(%arg0: i32, %arg1: i32) -> (i32, i32, i32) {
    %c0_i32 = arith.constant 0 : i32
    %c0_i32_0 = arith.constant 0 : i32
    %c0_i32_1 = arith.constant 0 : i32
    return %arg0, %c0_i32, %c0_i32_0 : i32, i32, i32
  }
  func.func @transform_2(%arg0: i32, %arg1: i32) -> (i32, i32, i32) {
    %c0_i32 = arith.constant 0 : i32
    %c0_i32_0 = arith.constant 0 : i32
    %c0_i32_1 = arith.constant 0 : i32
    return %arg0, %c0_i32, %c0_i32_0 : i32, i32, i32
  }
  func.func @transform_3(%arg0: i32, %arg1: i32) -> (i32, i32, i32) {
    %c0_i32 = arith.constant 0 : i32
    %c0_i32_0 = arith.constant 0 : i32
    %c0_i32_1 = arith.constant 0 : i32
    return %arg0, %c0_i32, %c0_i32_0 : i32, i32, i32
  }
  func.func @transform_4(%arg0: i32, %arg1: i32) -> (i32, i32, i32) {
    %c0_i32 = arith.constant 0 : i32
    %c0_i32_0 = arith.constant 0 : i32
    %c0_i32_1 = arith.constant 0 : i32
    return %arg0, %c0_i32, %c0_i32_0 : i32, i32, i32
  }
  func.func @transform_5(%arg0: i32, %arg1: i32) -> (i32, i32, i32, i32) {
    %c0_i32 = arith.constant 0 : i32
    %c0_i32_0 = arith.constant 0 : i32
    %c0_i32_1 = arith.constant 0 : i32
    return %arg0, %c0_i32, %arg1, %c0_i32_0 : i32, i32, i32, i32
  }
}

</mosaic_0001>

<bundles_post_ra>
// kernel: tpu_custom_call.1
= control target key start
LH: loop header
LB: loop body
LE: loop exit
PB: predicated region body
PF: predicated region fallthrough
CT: control target
= control target key end

     0   :  { %10 = vsyncpa [#allocation4], 0  ;;  %s1261_s0 = inlined_call_operand.vmem [shape: f32[2,2,4,32], index: 0, kind: input, shape index: {}]   ;;  %s1262_s1 = inlined_call_operand.vmem [shape: f32[2,32,32], index: 1, kind: input, shape index: {}]   ;;  %s1263_s2 = inlined_call_operand.vmem [shape: f32[2,1,32], index: 2, kind: input, shape index: {}]   ;;  %s1264_s3 = inlined_call_operand.vmem [shape: f32[2,32,11], index: 3, kind: input, shape index: {}]   ;;  %s1265_s4 = inlined_call_operand.vmem [shape: f32[2,1,11], index: 4, kind: input, shape index: {}]   ;;  %s1266_s5 = inlined_call_operand.hbm [shape: f32[2,2,4,11], index: 5, kind: output, shape index: {}]  }
   0x1   :  { %12 = vsyncpa [#allocation4 + $0x1], 0  ;;  %s1106_s18 = smov 0   ;;  %s1108_s19 = smov 0  }
   0x2   :  { %s1110_s20 = smov 0   ;;  %s1112_s21 = smov 0  }
   0x3   :  { %s1114_s22 = smov 0   ;;  %s1116_s23 = smov 0  }
   0x4 LB: > { %s813_s24 = sadd.s32 4294967295, %s1068_s23   ;;  %s814_s25 = sadd.s32 4294967294, %s1068_s23   ;;  %s1068_s23 = sphi %s1116_s23, %s18_s23   ;;  %s1064_s22 = sphi %s1114_s22, %s1273_s22   ;;  %s1060_s21 = sphi %s1112_s21, %s1272_s21   ;;  %s1056_s20 = sphi %s1110_s20, %s1271_s20   ;;  %s1052_s19 = sphi %s1108_s19, %s1270_s19   ;;  %s1048_s18 = sphi %s1106_s18, %s1269_s18  }
   0x5   : > { %s30_s26 = sadd.s32 1, %s1064_s22  ;;  %s39_s27 = sadd.s32 1, %s1056_s20 }
   0x6   : > { %p32_p0 = scmp.ge.s32.totalorder %s30_s26, 2  ;;  %p46_p1 = scmp.ne.s32.totalorder %s1056_s20, %s1052_s19 }
   0x7   : > { %p47_p2 = scmp.eq.s32.totalorder %s1068_s23, 0  ;;  %p182_p3 = scmp.eq.s32.totalorder %s813_s24, 1 }
   0x8   : > { %s1275_s26 = smov (%p32_p0, %s30_s26), 0  ;;  %p187_p6 = scmp.ne.s32.totalorder %s1052_s19, %s1048_s18 }
   0x9   : > { %p48_p4 = por %p47_p2, %p46_p1  ;;  %p1145_p5 = por %p182_p3, %p46_p1 }
   0xa   : > { %s34_s29 = ssub.s32 %s1064_s22, %s1275_s26  ;;  %p188_p8 = scmp.eq.s32.totalorder %s814_s25, 1 }
   0xb   : > { %p37_p7 = scmp.eq.s32.totalorder %s34_s29, 0  ;;  %p816_p10 = scmp.ge.s32.totalorder %s1068_s23, 2 }
   0xc   : > { %p1156_p9 = por %p188_p8, %p187_p6 }
   0xd   : > { %s1154_s30 = scalar_select %p37_p7, %s1056_s20, %s39_s27  }
   0xe   : > { %204 = sbr.rel (%p816_p10) target bundleno = 28 (0x1c), region = 16 }
  0x15   : > { %207 = sbr.rel (!%p48_p4) target bundleno = 28 (0x1c), region = 20  ;;  %s209_s7 = sand.u32 (%p48_p4), 1, %s1056_s20  }
  0x16   : > { %s818_s8 = sshll.u32 (%p48_p4), %s1064_s22, 2  ;;  %s817_s9 = sshll.u32 (%p48_p4), %s209_s7, 3 }
  0x17   : > { %s214_s12 = scalar_lea.vmem (%p48_p4), %s1261_s0, %s818_s8  ;;  %s211_s13 = scalar_lea.vmem (%p48_p4), [#allocation2], %s817_s9 }
  0x18   : > { %v230_v0 = vld [vmem:[%s214_s12] sm:$0xf] (%p48_p4)  ;;  %v232_v1 = vld [vmem:[%s214_s12 + $0x8] sm:$0xf] (%p48_p4) }
  0x19   : > { %231 = vst [vmem:[%s211_s13] sm:$0xf] (%p48_p4), %v230_v0  ;;  %233 = vst [vmem:[%s211_s13 + $0x4] sm:$0xf] (%p48_p4), %v232_v1 }
  0x1c PF: > { %p819_p11 = scmp.ge.s32.totalorder %s1068_s23, 1  ;;  %p287_p12 = scmp.lt.s32.totalorder %s1068_s23, 3 }
  0x1e   : > { %p288_p13 = pnand %p819_p11, %p287_p12 }
  0x1f   : > { %p337_p0 = scmp.lt.s32.totalorder (!%p288_p13), %s1060_s21, 1  ;;  %v1070_v2 = vmov (!%p288_p13), 0.0|0.0   ;;  %vm1071_vm0 = vmmov (!%p288_p13), 0   ;;  %v1072_v3 = vmov (!%p288_p13), 0.0   ;;  %s294_s16 = sand.u32 (!%p288_p13), 1, %s1052_s19   ;;  %vm370_vm1 = vcmask (!%p288_p13), 261120  }
  0x20   : > { %291 = sbr.rel (%p288_p13) target bundleno = 506 (0x1fa), region = 77  ;;  %906 = vmatprep.subr.bf16.mxu0 (!%p288_p13), %v1070_v2  ;;  %870 = vmatprep.mubr.msk.f32.mxu0 (!%p288_p13), %vm1071_vm0, %v1072_v3  ;;  %s1186_s8 = sshll.u32 (!%p288_p13), %s294_s16, 3  ;;  %vm524_vm2 = vcmask (!%p288_p13), 84992  }
  0x21   : > { %912 = vmatprep.subr.bf16.mxu1 (!%p288_p13), %v1070_v2  ;;  %881 = vmatprep.mubr.msk.f32.mxu1 (!%p288_p13), %vm1071_vm0, %v1072_v3  ;;  %s296_s9 = scalar_lea.vmem (!%p288_p13), [#allocation2], %s1186_s8  ;;  %s336_s24 = scalar_lea.vmem (!%p288_p13), [#allocation3], %s1186_s8 }
  0x22   : > { %v363_v13 = vld [vmem:[%s296_s9] sm:$0xf] (!%p288_p13)  ;;  %v830_v14 = vld [vmem:[%s296_s9 + $0x4] sm:$0xf] (!%p288_p13)  ;;  %s841_s27 = sshll.u32 (!%p288_p13), %s1060_s21, 7  ;;  %s1214_s9 = scalar_lea.sflag (!%p288_p13), [#allocation4], %s294_s16 }
  0x27   : > { %s1173_s14 = scalar_select %p337_p0, %s1060_s21, 1 }
  0x28   : > { %s1073_s21 = smov [#allocation3]  }
  0x29   : > { %s839_s15 = sshll.u32 %s1173_s14, 5  ;;  %s344_s12 = scalar_lea.vmem %s1263_s2, %s1173_s14 }
  0x2a   : > { %s341_s25 = scalar_lea.vmem %s1262_s1, %s839_s15  ;;  %s349_s7 = scalar_lea.vmem %s1264_s3, %s839_s15  ;;  %v826_v18 = vld [vmem:[%s344_s12] ss:$0 sm:$0xff] }
  0x2b   : > { %v353_v4 = vld [vmem:[%s341_s25] sm:$0xff]  ;;  %v354_v5 = vld [vmem:[%s341_s25 + $0x8] sm:$0xff]  ;;  %v355_v6 = vld [vmem:[%s341_s25 + $0x10] sm:$0xff]  ;;  %s352_s17 = scalar_lea.vmem %s1265_s4, %s1173_s14  ;;  %s1210_s14 = scalar_lea.hbm %s1266_s5, %s841_s27 }
  0x2c   : > { %v907_v7 = vpack.c.bf16 %v354_v5, %v353_v4  ;;  %v356_v8 = vld [vmem:[%s341_s25 + $0x18] sm:$0xff]  ;;  %v358_v9 = vld [vmem:[%s349_s7] sm:$0xff]  ;;  %v359_v10 = vld [vmem:[%s349_s7 + $0x8] sm:$0xff]  ;;  %s692_s25 = sshll.u32 %s336_s24, 4  ;;  %s994_s10 = sshll.u32 %s1073_s21, 4  ;;  %s1205_s25 = int_to_ptr.vmem [resolvable:$true] %s692_s25  ;;  %s995_s10 = int_to_ptr.vmem [resolvable:$false] %s994_s10 }
  0x2d   : > { %v913_v11 = vpack.c.bf16 %v359_v10, %v358_v9  ;;  %v910_v12 = vpack.c.bf16 %v356_v8, %v355_v6  ;;  %v360_v15 = vld [vmem:[%s349_s7 + $0x10] sm:$0xff]  ;;  %v361_v16 = vld [vmem:[%s349_s7 + $0x18] sm:$0xff]  ;;  %v828_v27 = vld [vmem:[%s352_s17] ss:$0 sm:$0xff]  ;;  %s990_s8 = scalar_lea.vmem %s1205_s25, 128  ;;  %s996_s11 = scalar_lea.vmem %s995_s10, 256 }
  0x2e   : > { %908 = vmatpush3.bf16.msra.mxu0 %v907_v7  ;;  %v916_v17 = vpack.c.bf16 %v361_v16, %v360_v15  ;;  %p991_p1 = scmp.ne.s32.totalorder %s1205_s25, %s990_s8  ;;  %p997_p4 = scmp.lt.s32.totalorder %s1205_s25, %s995_s10 }
  0x2f   : > { %909 = vmatprep.subr.bf16.mxu0 %v1070_v2  ;;  %914 = vmatpush3.bf16.msra.mxu1 %v913_v11  ;;  %p998_p6 = scmp.lt.s32.totalorder %s996_s11, %s990_s8 }
  0x30   : > { %915 = vmatprep.subr.bf16.mxu1 %v1070_v2  ;;  %p992_p2 = pnand %p991_p1, %p1145_p5 }
  0x31   : > { %p999_p7 = por %p998_p6, %p997_p4 }
  0x32   : > { %911 = vmatpush3.bf16.msra.mxu0 %v910_v12  ;;  %p993_p3 = pneg %p992_p2 }
  0x33   : > { %918 = vmatprep.subr.bf16.mxu0 %v1070_v2  ;;  %917 = vmatpush3.bf16.msra.mxu1 %v916_v17 }
  0x34   : > { %924 = vmatprep.subr.bf16.mxu1 %v1070_v2  ;;  %p1000_p8 = pnand %p999_p7, %p993_p3 }
  0x35   : > { %871 = vmatmul.mubr.msk.f32.vlgmr.msra.gmra.mrb[0].mxu0 %vm370_vm1, %v363_v13 }
  0x36   : > { %920 = vmatpush3.bf16.msra.mxu0 %v907_v7  ;;  %892 = vmatprep.mubr.msk.f32.mxu0 %vm1071_vm0, %v1072_v3 }
  0x37   : > { %921 = vmatprep.subr.bf16.mxu0 %v1070_v2 }
  0x3a   : > { %923 = vmatpush3.bf16.msra.mxu0 %v910_v12 }
  0x3d   : > { %893 = vmatmul.mubr.msk.f32.vlgmr.msra.gmra.mrb[2].mxu0 %vm370_vm1, %v830_v14 }
 0x108   : > { %v440_v19 = vpop.f32.mrb[0].mxu0 }
 0x109   : > { %v441_v20 = vadd.f32 %v826_v18, %v440_v19  ;;  %v872_v21 = vpop.f32.mrb[1].mxu0 }
 0x10b   : > { %v444_v22 = vmax.f32 %v441_v20, 0.0 }
 0x10d   : > { %882 = vmatmul.mubr.msk.f32.vlgmr.msra.gmra.mrb[0].mxu1 %vm370_vm1, %v444_v22 }
 0x10e   : > { %926 = vmatpush3.bf16.msra.mxu1 %v913_v11  ;;  %903 = vmatprep.mubr.msk.f32.mxu1 %vm1071_vm0, %v1072_v3 }
 0x10f   : > { %927 = vmatprep.subr.bf16.mxu1 %v1070_v2 }
 0x110   : > { %v597_v23 = vpop.f32.mrb[2].mxu0 }
 0x111   : > { %v598_v24 = vadd.f32 %v826_v18, %v597_v23  ;;  %v894_v25 = vpop.f32.mrb[3].mxu0 }
 0x112   : > { %929 = vmatpush3.bf16.msra.mxu1 %v916_v17 }
 0x113   : > { %v601_v26 = vmax.f32 %v598_v24, 0.0 }
 0x115   : > { %904 = vmatmul.mubr.msk.f32.vlgmr.msra.gmra.mrb[2].mxu1 %vm370_vm1, %v601_v26 }
 0x1e0   : > { %v520_v28 = vpop.f32.mrb[0].mxu1 }
 0x1e1   : > { %v521_v29 = vadd.f32 %v828_v27, %v520_v28  ;;  %v883_v30 = vpop.f32.mrb[1].mxu1 }
 0x1e3   : > { %525 = vst.msk [vmem:[%s336_s24] sm:$0xf] %vm524_vm2, %v521_v29 }
 0x1e8   : > { %v671_v31 = vpop.f32.mrb[2].mxu1 }
 0x1e9   : > { %v672_v32 = vadd.f32 %v828_v27, %v671_v31  ;;  %v905_v33 = vpop.f32.mrb[3].mxu1 }
 0x1eb   : > { %833 = vst.msk [vmem:[%s336_s24 + $0x4] sm:$0xf] %vm524_vm2, %v672_v32 }
 0x1ec   : > { %1003 = shalt.err (!%p1000_p8)
}
 0x1ed   : > { %s1004_s16 = scalar_lea.hbm %s1210_s14, 128  ;;  %s1008_s15 = scalar_lea.hbm %s1266_s5, 256 }
 0x1ee   : > { %p1005_p11 = scmp.ne.s32.totalorder %s1210_s14, %s1004_s16  ;;  %p1009_p0 = scmp.lt.u32.totalorder %s1210_s14, %s1266_s5 }
 0x1ef   : > { %p1010_p1 = scmp.lt.u32.totalorder %s1008_s15, %s1004_s16  ;;  %p1012_p3 = scmp.lt.u32.totalorder %s1004_s16, %s1210_s14 }
 0x1f0   : > { %p1006_p12 = pnand %p1005_p11, %p1145_p5 }
 0x1f1   : > { %p1011_p2 = por %p1010_p1, %p1009_p0 }
 0x1f2   : > { %p1007_p13 = pneg %p1006_p12 }
 0x1f3   : > { %p1013_p4 = por %p1012_p3, %p1011_p2 }
 0x1f5   : > { %p1014_p6 = pnand %p1013_p4, %p1007_p13 }
 0x1f7   : > { %1017 = shalt.err (!%p1014_p6)
}
 0x1f8   : > { %s1074_s27 = smov 64   ;;  %s1075_s29 = smov 4  }
 0x1f9   : > { %930 = dma.vmem_to_hbm [thread:$0]  (%p1145_p5), %s1205_s25, 128, %s1210_s14, %s1214_s9, %s1074_s27, %s1074_s27, %s1075_s29  }
 0x1fa PF: > { %s707_s7 = sand.u32 1, %s1048_s18   ;;  %p933_p7 = pnand %p816_p10, %p1156_p9 }
 0x1fb   : > { %s708_s8 = scalar_lea.sflag [#allocation4], %s707_s7 }
 0x1fc   : > { %1043 = dma.done.wait (!%p933_p7), %s708_s8, 128  }
 0x1fd   : > { %1045 = vsyncadd (!%p933_p7), %s708_s8, 4294967168  ;;  %s18_s23 = sadd.s32 1, %s1068_s23   ;;  %s1269_s18 = smov %s1052_s19 }
 0x1fe   : > { %p15_p8 = scmp.ge.s32.totalorder %s18_s23, 4   ;;  %s1270_s19 = smov %s1056_s20 }
 0x1ff   : > { %s1271_s20 = smov %s1154_s30  ;;  %s1272_s21 = smov %s1064_s22 }
 0x200   : > { %s1273_s22 = smov %s1275_s26  ;;  %17 = sbr.rel (!%p15_p8) target bundleno = 4 (0x4), region = 135 }
 0x207   :  { %713 = vsyncpa [#allocation4], 1 }
 0x208   :  { %715 = vsyncpa [#allocation4 + $0x1], 1 }

</bundles_post_ra>
